<compile_context>
chip_gen: v5e
topology: v5e:2x2
jax: 0.10.0
libtpu: 0.0.40
codegen_flags: <defaults>
</compile_context>

<pallas_src>
import functools

import jax
import jax.numpy as jnp
import numpy as np
from jax.experimental import pallas as pl
from jax.experimental.pallas import tpu as pltpu


def _spt_propagate_kernel(nbr_q_ref, rel_q_ref, aux_ref, out_ref, *, K):
    # nbr_q_ref / rel_q_ref: (4*K, tn), rows c*K..c*K+K-1 = quaternion component c.
    # aux_ref: (5+K, tn), rows 0:4 cur_q, row 4 self-logit (*16), rows 5:5+K nbr logits
    #          (already nbr_l * edge_w * 16).
    qw = nbr_q_ref[0 * K:1 * K, :]          # (K, tn) each, lane-dense in N
    qx = nbr_q_ref[1 * K:2 * K, :]
    qy = nbr_q_ref[2 * K:3 * K, :]
    qz = nbr_q_ref[3 * K:4 * K, :]
    rw = rel_q_ref[0 * K:1 * K, :]
    rx = rel_q_ref[1 * K:2 * K, :]
    ry = rel_q_ref[2 * K:3 * K, :]
    rz = rel_q_ref[3 * K:4 * K, :]

    # accu_q = qmul(rel_q, nbr_q) — Hamilton product, (w, x, y, z) convention
    aw = rw * qw - rx * qx - ry * qy - rz * qz
    ax = rw * qx + rx * qw + ry * qz - rz * qy
    ay = rw * qy - rx * qz + ry * qw + rz * qx
    az = rw * qz + rx * qy - ry * qx + rz * qw

    # softmax over [self, K neighbors]; logits already carry the *16 temperature.
    # Padded/ragged tail lanes see zero (or garbage) logits — per-lane only, sliced off
    # by the wrapper, never a cross-lane hazard.
    logit_self = aux_ref[4:5, :]                                    # (1, tn)
    logit_nbr = aux_ref[5:5 + K, :]                                 # (K, tn)
    m = jnp.maximum(jnp.max(logit_nbr, axis=0, keepdims=True), logit_self)
    e_self = jnp.exp(logit_self - m)                                # (1, tn)
    e_nbr = jnp.exp(logit_nbr - m)                                  # (K, tn)
    denom = e_self + jnp.sum(e_nbr, axis=0, keepdims=True)          # (1, tn)
    inv = pl.reciprocal(denom, approx=True)                         # EUP, off the VALU
    w_self = e_self * inv                                           # (1, tn)
    w_nbr = e_nbr * inv                                             # (K, tn)

    cur_q = aux_ref[0:4, :]                                         # (4, tn)

    # weighted sum over the K+1 candidates: four direct lane-dense row stores
    # (no sublane-axis concatenate temporary).
    out_ref[0:1, :] = w_self * cur_q[0:1, :] + jnp.sum(w_nbr * aw, axis=0, keepdims=True)
    out_ref[1:2, :] = w_self * cur_q[1:2, :] + jnp.sum(w_nbr * ax, axis=0, keepdims=True)
    out_ref[2:3, :] = w_self * cur_q[2:3, :] + jnp.sum(w_nbr * ay, axis=0, keepdims=True)
    out_ref[3:4, :] = w_self * cur_q[3:4, :] + jnp.sum(w_nbr * az, axis=0, keepdims=True)


def spt_level_propagate(node_levels, node_q, src_idx, edge_rel_q, edge_w, *, tn=32768):
    """One SptLevelPropagate.forward step.

    node_levels: (N, 1) f32   node levels 'l'
    node_q:      (N, 4) f32   node quaternions 'q'
    src_idx:     (N, K) i32   source node of the k-th incoming edge of node i
    edge_rel_q:  (N, K, 4) f32 edge relative quaternions (or pre-flattened (4*K, N))
    edge_w:      (N, K) f32   edge weights
    returns:     (N, 4) f32   propagated quaternions
    """
    N, K = src_idx.shape
    dtype = node_q.dtype

    # --- glue: gather neighbors directly into the flattened node-on-lanes layout ----
    idx_t = src_idx.T                                              # (K, N)
    nbr_q = jnp.take(node_q.T, idx_t, axis=1).reshape(4 * K, N)    # (4K, N)
    if edge_rel_q.ndim == 3:
        rel_q = jnp.transpose(edge_rel_q, (2, 1, 0)).reshape(4 * K, N)   # (4K, N)
    else:
        rel_q = edge_rel_q                                         # already (4K, N)
    # pre-fused neighbor logits: fold edge_w and the *16 temperature into the gather
    nbr_logit = jnp.take(node_levels[:, 0], idx_t, axis=0) * edge_w.T * 16.0   # (K, N)
    aux = jnp.concatenate(
        [node_q.T.astype(dtype),
         node_levels.T.astype(dtype) * 16.0,
         nbr_logit.astype(dtype)], axis=0)                         # (5+K, N)

    # --- tile the node (lane) axis ---------------------------------------------------
    tn_eff = min(tn, N)
    if tn_eff < N:
        tn_eff = min(((tn_eff + 127) // 128) * 128, N)             # lane-aligned tiles
    grid = (pl.cdiv(N, tn_eff),)                                   # ragged tail handled
                                                                   # by masked edge blocks

    out_t = pl.pallas_call(
        functools.partial(_spt_propagate_kernel, K=K),
        out_shape=jax.ShapeDtypeStruct((4, N), dtype),
        grid_spec=pltpu.PrefetchScalarGridSpec(
            num_scalar_prefetch=0,
            grid=grid,
            in_specs=[
                pl.BlockSpec((4 * K, tn_eff), lambda i: (0, i)),   # nbr_q  (4K, N)
                pl.BlockSpec((4 * K, tn_eff), lambda i: (0, i)),   # rel_q  (4K, N)
                pl.BlockSpec((5 + K, tn_eff), lambda i: (0, i)),   # aux    (5+K, N)
            ],
            out_specs=pl.BlockSpec((4, tn_eff), lambda i: (0, i)),
        ),
        compiler_params=pltpu.CompilerParams(
            dimension_semantics=("parallel",),
            vmem_limit_bytes=64 * 1024 * 1024),
    )(nbr_q, rel_q, aux)

    # TODO(synk): consumers that accept node-on-lanes (4, N) output should take out_t
    # directly and skip this final transpose pass.
    return out_t.T                                                 # (N, 4)


def spt_level_propagate_ref(node_levels, node_q, src_idx, edge_rel_q, edge_w):
    """Pure-JAX reference mirroring the PyTorch reduce_func exactly."""
    nbr_q = node_q[src_idx]                  # (N, K, 4)
    nbr_l = node_levels[src_idx, 0]          # (N, K)
    r, q = edge_rel_q, nbr_q
    aw = r[..., 0] * q[..., 0] - r[..., 1] * q[..., 1] - r[..., 2] * q[..., 2] - r[..., 3] * q[..., 3]
    ax = r[..., 0] * q[..., 1] + r[..., 1] * q[..., 0] + r[..., 2] * q[..., 3] - r[..., 3] * q[..., 2]
    ay = r[..., 0] * q[..., 2] - r[..., 1] * q[..., 3] + r[..., 2] * q[..., 0] + r[..., 3] * q[..., 1]
    az = r[..., 0] * q[..., 3] + r[..., 1] * q[..., 2] - r[..., 2] * q[..., 1] + r[..., 3] * q[..., 0]
    accu_q = jnp.stack([aw, ax, ay, az], axis=-1)                    # (N, K, 4)
    in_q = jnp.concatenate([node_q[:, None, :], accu_q], axis=1)     # (N, K+1, 4)
    in_l = jnp.concatenate([node_levels, nbr_l * edge_w], axis=1)    # (N, K+1)
    sm = jax.nn.softmax(in_l * 16.0, axis=1)
    return jnp.sum(sm[..., None] * in_q, axis=1)                     # (N, 4)


if __name__ == "__main__":
    key = jax.random.PRNGKey(0)
    N, K = 16, 4
    k1, k2, k3, k4, k5 = jax.random.split(key, 5)

    node_levels = jax.random.uniform(k1, (N, 1), jnp.float32)
    node_q = jax.random.normal(k2, (N, 4), jnp.float32)
    node_q = node_q / jnp.linalg.norm(node_q, axis=1, keepdims=True)
    edge_rel_q = jax.random.normal(k3, (N, K, 4), jnp.float32)
    edge_rel_q = edge_rel_q / jnp.linalg.norm(edge_rel_q, axis=-1, keepdims=True)
    edge_w = jax.random.uniform(k4, (N, K), jnp.float32)
    src_idx = jax.random.randint(k5, (N, K), 0, N, dtype=jnp.int32)

    out = spt_level_propagate(node_levels, node_q, src_idx, edge_rel_q, edge_w)
    out = jax.block_until_ready(out)

    ref = spt_level_propagate_ref(node_levels, node_q, src_idx, edge_rel_q, edge_w)
    # tolerance loosened slightly for pl.reciprocal(approx=True)
    np.testing.assert_allclose(np.asarray(out), np.asarray(ref), rtol=2e-3, atol=2e-3)
    print("KERNEL_OK")
</pallas_src>

<mosaic_0001>
module attributes {stable_mosaic.version = 11 : i64} {
  func.func @_spt_propagate_kernel(%arg0: i32, %arg1: memref<16x16xf32, #tpu.memory_space<vmem>>, %arg2: memref<16x16xf32, #tpu.memory_space<vmem>>, %arg3: memref<9x16xf32, #tpu.memory_space<vmem>>, %arg4: memref<4x16xf32, #tpu.memory_space<vmem>>) attributes {dimension_semantics = [#tpu.dimension_semantics<parallel>], iteration_bounds = array<i64: 1>, scalar_prefetch = 0 : i64, scratch_operands = 0 : i64, tpu.core_type = #tpu.core_type<tc>, window_params = [{transform_indices = @transform_0, window_bounds = array<i64: 16, 16>}, {transform_indices = @transform_1, window_bounds = array<i64: 16, 16>}, {transform_indices = @transform_2, window_bounds = array<i64: 9, 16>}, {transform_indices = @transform_3, window_bounds = array<i64: 4, 16>}]} {
    %c0 = arith.constant 0 : index
    %c0_0 = arith.constant 0 : index
    %0 = vector.load %arg1[%c0, %c0_0] : memref<16x16xf32, #tpu.memory_space<vmem>>, vector<4x16xf32>
    %c4 = arith.constant 4 : index
    %c0_1 = arith.constant 0 : index
    %1 = vector.load %arg1[%c4, %c0_1] : memref<16x16xf32, #tpu.memory_space<vmem>>, vector<4x16xf32>
    %c8 = arith.constant 8 : index
    %c0_2 = arith.constant 0 : index
    %2 = vector.load %arg1[%c8, %c0_2] : memref<16x16xf32, #tpu.memory_space<vmem>>, vector<4x16xf32>
    %c12 = arith.constant 12 : index
    %c0_3 = arith.constant 0 : index
    %3 = vector.load %arg1[%c12, %c0_3] : memref<16x16xf32, #tpu.memory_space<vmem>>, vector<4x16xf32>
    %c0_4 = arith.constant 0 : index
    %c0_5 = arith.constant 0 : index
    %4 = vector.load %arg2[%c0_4, %c0_5] : memref<16x16xf32, #tpu.memory_space<vmem>>, vector<4x16xf32>
    %c4_6 = arith.constant 4 : index
    %c0_7 = arith.constant 0 : index
    %5 = vector.load %arg2[%c4_6, %c0_7] : memref<16x16xf32, #tpu.memory_space<vmem>>, vector<4x16xf32>
    %c8_8 = arith.constant 8 : index
    %c0_9 = arith.constant 0 : index
    %6 = vector.load %arg2[%c8_8, %c0_9] : memref<16x16xf32, #tpu.memory_space<vmem>>, vector<4x16xf32>
    %c12_10 = arith.constant 12 : index
    %c0_11 = arith.constant 0 : index
    %7 = vector.load %arg2[%c12_10, %c0_11] : memref<16x16xf32, #tpu.memory_space<vmem>>, vector<4x16xf32>
    %8 = arith.mulf %4, %0 : vector<4x16xf32>
    %9 = arith.mulf %5, %1 : vector<4x16xf32>
    %10 = arith.subf %8, %9 : vector<4x16xf32>
    %11 = arith.mulf %6, %2 : vector<4x16xf32>
    %12 = arith.subf %10, %11 : vector<4x16xf32>
    %13 = arith.mulf %7, %3 : vector<4x16xf32>
    %14 = arith.subf %12, %13 : vector<4x16xf32>
    %15 = arith.mulf %4, %1 : vector<4x16xf32>
    %16 = arith.mulf %5, %0 : vector<4x16xf32>
    %17 = arith.addf %15, %16 : vector<4x16xf32>
    %18 = arith.mulf %6, %3 : vector<4x16xf32>
    %19 = arith.addf %17, %18 : vector<4x16xf32>
    %20 = arith.mulf %7, %2 : vector<4x16xf32>
    %21 = arith.subf %19, %20 : vector<4x16xf32>
    %22 = arith.mulf %4, %2 : vector<4x16xf32>
    %23 = arith.mulf %5, %3 : vector<4x16xf32>
    %24 = arith.subf %22, %23 : vector<4x16xf32>
    %25 = arith.mulf %6, %0 : vector<4x16xf32>
    %26 = arith.addf %24, %25 : vector<4x16xf32>
    %27 = arith.mulf %7, %1 : vector<4x16xf32>
    %28 = arith.addf %26, %27 : vector<4x16xf32>
    %29 = arith.mulf %4, %3 : vector<4x16xf32>
    %30 = arith.mulf %5, %2 : vector<4x16xf32>
    %31 = arith.addf %29, %30 : vector<4x16xf32>
    %32 = arith.mulf %6, %1 : vector<4x16xf32>
    %33 = arith.subf %31, %32 : vector<4x16xf32>
    %34 = arith.mulf %7, %0 : vector<4x16xf32>
    %35 = arith.addf %33, %34 : vector<4x16xf32>
    %c4_12 = arith.constant 4 : index
    %c0_13 = arith.constant 0 : index
    %36 = vector.load %arg3[%c4_12, %c0_13] : memref<9x16xf32, #tpu.memory_space<vmem>>, vector<1x16xf32>
    %c5 = arith.constant 5 : index
    %c0_14 = arith.constant 0 : index
    %37 = vector.load %arg3[%c5, %c0_14] : memref<9x16xf32, #tpu.memory_space<vmem>>, vector<4x16xf32>
    %cst = arith.constant dense<0xFF800000> : vector<16xf32>
    %38 = vector.multi_reduction <maximumf>, %37, %cst [0] : vector<4x16xf32> to vector<16xf32>
    %39 = vector.shape_cast %38 : vector<16xf32> to vector<1x16xf32>
    %40 = arith.maximumf %39, %36 : vector<1x16xf32>
    %41 = arith.subf %36, %40 : vector<1x16xf32>
    %42 = math.exp %41 : vector<1x16xf32>
    %43 = vector.broadcast %40 : vector<1x16xf32> to vector<4x16xf32>
    %44 = arith.subf %37, %43 : vector<4x16xf32>
    %45 = math.exp %44 : vector<4x16xf32>
    %cst_15 = arith.constant dense<0.000000e+00> : vector<16xf32>
    %46 = vector.multi_reduction <add>, %45, %cst_15 [0] : vector<4x16xf32> to vector<16xf32>
    %47 = vector.shape_cast %46 : vector<16xf32> to vector<1x16xf32>
    %48 = arith.addf %42, %47 : vector<1x16xf32>
    %49 = tpu.reciprocal %48 {approx = true} : vector<1x16xf32> -> vector<1x16xf32>
    %50 = arith.mulf %42, %49 : vector<1x16xf32>
    %51 = vector.broadcast %49 : vector<1x16xf32> to vector<4x16xf32>
    %52 = arith.mulf %45, %51 : vector<4x16xf32>
    %c0_16 = arith.constant 0 : index
    %c0_17 = arith.constant 0 : index
    %53 = vector.load %arg3[%c0_16, %c0_17] : memref<9x16xf32, #tpu.memory_space<vmem>>, vector<4x16xf32>
    %54 = vector.extract_strided_slice %53 {offsets = [0, 0], sizes = [1, 16], strides = [1, 1]} : vector<4x16xf32> to vector<1x16xf32>
    %55 = arith.mulf %50, %54 : vector<1x16xf32>
    %56 = arith.mulf %52, %14 : vector<4x16xf32>
    %cst_18 = arith.constant dense<0.000000e+00> : vector<16xf32>
    %57 = vector.multi_reduction <add>, %56, %cst_18 [0] : vector<4x16xf32> to vector<16xf32>
    %58 = vector.shape_cast %57 : vector<16xf32> to vector<1x16xf32>
    %59 = arith.addf %55, %58 : vector<1x16xf32>
    %c0_19 = arith.constant 0 : index
    %c0_20 = arith.constant 0 : index
    %60 = vector.load %arg4[%c0_19, %c0_20] : memref<4x16xf32, #tpu.memory_space<vmem>>, vector<1x16xf32>
    tpu.vector_store %arg4[%c0_19, %c0_20], %59 {strides = array<i32>} : memref<4x16xf32, #tpu.memory_space<vmem>>, vector<1x16xf32>,
    %61 = vector.extract_strided_slice %53 {offsets = [1, 0], sizes = [1, 16], strides = [1, 1]} : vector<4x16xf32> to vector<1x16xf32>
    %62 = arith.mulf %50, %61 : vector<1x16xf32>
    %63 = arith.mulf %52, %21 : vector<4x16xf32>
    %cst_21 = arith.constant dense<0.000000e+00> : vector<16xf32>
    %64 = vector.multi_reduction <add>, %63, %cst_21 [0] : vector<4x16xf32> to vector<16xf32>
    %65 = vector.shape_cast %64 : vector<16xf32> to vector<1x16xf32>
    %66 = arith.addf %62, %65 : vector<1x16xf32>
    %c1 = arith.constant 1 : index
    %c0_22 = arith.constant 0 : index
    %67 = vector.load %arg4[%c1, %c0_22] : memref<4x16xf32, #tpu.memory_space<vmem>>, vector<1x16xf32>
    tpu.vector_store %arg4[%c1, %c0_22], %66 {strides = array<i32>} : memref<4x16xf32, #tpu.memory_space<vmem>>, vector<1x16xf32>,
    %68 = vector.extract_strided_slice %53 {offsets = [2, 0], sizes = [1, 16], strides = [1, 1]} : vector<4x16xf32> to vector<1x16xf32>
    %69 = arith.mulf %50, %68 : vector<1x16xf32>
    %70 = arith.mulf %52, %28 : vector<4x16xf32>
    %cst_23 = arith.constant dense<0.000000e+00> : vector<16xf32>
    %71 = vector.multi_reduction <add>, %70, %cst_23 [0] : vector<4x16xf32> to vector<16xf32>
    %72 = vector.shape_cast %71 : vector<16xf32> to vector<1x16xf32>
    %73 = arith.addf %69, %72 : vector<1x16xf32>
    %c2 = arith.constant 2 : index
    %c0_24 = arith.constant 0 : index
    %74 = vector.load %arg4[%c2, %c0_24] : memref<4x16xf32, #tpu.memory_space<vmem>>, vector<1x16xf32>
    tpu.vector_store %arg4[%c2, %c0_24], %73 {strides = array<i32>} : memref<4x16xf32, #tpu.memory_space<vmem>>, vector<1x16xf32>,
    %75 = vector.extract_strided_slice %53 {offsets = [3, 0], sizes = [1, 16], strides = [1, 1]} : vector<4x16xf32> to vector<1x16xf32>
    %76 = arith.mulf %50, %75 : vector<1x16xf32>
    %77 = arith.mulf %52, %35 : vector<4x16xf32>
    %cst_25 = arith.constant dense<0.000000e+00> : vector<16xf32>
    %78 = vector.multi_reduction <add>, %77, %cst_25 [0] : vector<4x16xf32> to vector<16xf32>
    %79 = vector.shape_cast %78 : vector<16xf32> to vector<1x16xf32>
    %80 = arith.addf %76, %79 : vector<1x16xf32>
    %c3 = arith.constant 3 : index
    %c0_26 = arith.constant 0 : index
    %81 = vector.load %arg4[%c3, %c0_26] : memref<4x16xf32, #tpu.memory_space<vmem>>, vector<1x16xf32>
    tpu.vector_store %arg4[%c3, %c0_26], %80 {strides = array<i32>} : memref<4x16xf32, #tpu.memory_space<vmem>>, vector<1x16xf32>,
    return
  }
  func.func @transform_0(%arg0: i32) -> (i32, i32) {
    %c0_i32 = arith.constant 0 : i32
    %c0_i32_0 = arith.constant 0 : i32
    return %c0_i32, %arg0 : i32, i32
  }
  func.func @transform_1(%arg0: i32) -> (i32, i32) {
    %c0_i32 = arith.constant 0 : i32
    %c0_i32_0 = arith.constant 0 : i32
    return %c0_i32, %arg0 : i32, i32
  }
  func.func @transform_2(%arg0: i32) -> (i32, i32) {
    %c0_i32 = arith.constant 0 : i32
    %c0_i32_0 = arith.constant 0 : i32
    return %c0_i32, %arg0 : i32, i32
  }
  func.func @transform_3(%arg0: i32) -> (i32, i32) {
    %c0_i32 = arith.constant 0 : i32
    %c0_i32_0 = arith.constant 0 : i32
    return %c0_i32, %arg0 : i32, i32
  }
}

</mosaic_0001>

<bundles_post_ra>
// kernel: tpu_custom_call.1
= control target key start
LH: loop header
LB: loop body
LE: loop exit
PB: predicated region body
PF: predicated region fallthrough
CT: control target
= control target key end

     0   :  { %8 = vsyncpa [#allocation3], 0  ;;  %s357_s0 = inlined_call_operand.hbm [shape: f32[16,16], index: 0, kind: input, shape index: {}]   ;;  %s358_s1 = inlined_call_operand.hbm [shape: f32[16,16], index: 1, kind: input, shape index: {}]   ;;  %s359_s2 = inlined_call_operand.hbm [shape: f32[9,16], index: 2, kind: input, shape index: {}]   ;;  %s360_s3 = inlined_call_operand.hbm [shape: f32[4,16], index: 3, kind: output, shape index: {}]  }
   0x1   :  { %9 = vsyncpa [#allocation6], 0 }
   0x2   :  { %10 = vsyncpa [#allocation4], 0  ;;  %s28_s14 = sshll.u32 %s358_s1, 4  ;;  %s313_s15 = smov [#allocation5]   ;;  %s29_s14 = int_to_ptr.hbm [resolvable:$true] %s28_s14 }
   0x3   :  { %s30_s16 = sshll.u32 %s313_s15, 4  ;;  %s15_s19 = sshll.u32 %s357_s0, 4  ;;  %s31_s16 = int_to_ptr.vmem [resolvable:$true] %s30_s16  ;;  %s16_s19 = int_to_ptr.hbm [resolvable:$true] %s15_s19 }
   0x4   :  { %s314_s20 = smov 128   ;;  %s315_s21 = smov 8  }
   0x5   :  { %36 = dma.hbm_to_vmem [thread:$0]  %s29_s14, 256, %s31_s16, [#allocation6], %s314_s20, %s314_s20, %s315_s21  }
   0x6   :  { %s316_s22 = smov [#allocation2]   ;;  %s41_s26 = sshll.u32 %s359_s2, 4  ;;  %s42_s26 = int_to_ptr.hbm [resolvable:$true] %s41_s26 }
   0x7   :  { %s17_s23 = sshll.u32 %s316_s22, 4  ;;  %s317_s1 = smov [#allocation7]   ;;  %s18_s23 = int_to_ptr.vmem [resolvable:$true] %s17_s23 }
   0x8   :  { %23 = dma.hbm_to_vmem [thread:$0]  %s16_s19, 256, %s18_s23, [#allocation3], %s314_s20, %s314_s20, %s315_s21  }
   0x9   :  { %s43_s27 = sshll.u32 %s317_s1, 4  ;;  %s44_s27 = int_to_ptr.vmem [resolvable:$true] %s43_s27 }
   0xa   :  { %49 = dma.hbm_to_vmem [thread:$0]  %s42_s26, 256, %s44_s27, [#allocation6], %s314_s20, %s314_s20, %s315_s21  }
   0xb   :  { %307 = dma.done.wait [#allocation3], 256  }
   0xc   :  { %308 = vsyncadd [#allocation3], 4294967040 }
   0xd   :  { %309 = dma.done.wait [#allocation6], 512  }
   0xe   :  { %310 = vsyncadd [#allocation6], 4294966784  ;;  %vm100_vm0 = vcmask 125952   ;;  %v99_v0 = vld [vmem:[#allocation7 + $0x5] sm:$0xf]  ;;  %vm139_vm1 = vcmask 122880  }
   0xf   :  { %v101_v1 = vsel %vm100_vm0, %v99_v0, -inf  ;;  %v98_v7 = vld [vmem:[#allocation7 + $0x4] sm:$0x1]  ;;  %v62_v19 = vld [vmem:[#allocation2] sm:$0xf]  ;;  %s318_s0 = smov [#allocation8]  }
  0x10   :  { %v102_v2 = vrot.slane %v101_v1, 4  ;;  %v66_v20 = vld [vmem:[#allocation5] sm:$0xf]  ;;  %v63_v22 = vld [vmem:[#allocation2 + $0x4] sm:$0xf]  ;;  %s186_s2 = sshll.u32 %s318_s0, 4  ;;  %s187_s2 = int_to_ptr.vmem [resolvable:$true] %s186_s2 }
  0x11   :  { %v67_v23 = vld [vmem:[#allocation5 + $0x4] sm:$0xf]  ;;  %v64_v24 = vld [vmem:[#allocation2 + $0x8] sm:$0xf]  ;;  %v65_v25 = vld [vmem:[#allocation2 + $0xc] sm:$0xf]  ;;  %v70_v27 = vmul.f32 %v66_v20, %v62_v19  ;;  %v77_v31 = vmul.f32 %v66_v20, %v63_v22 }
  0x12   :  { %v103_v3 = vmax.f32 %v101_v1, %v102_v2  ;;  %v68_v28 = vld [vmem:[#allocation5 + $0x8] sm:$0xf]  ;;  %v71_v29 = vmul.f32 %v67_v23, %v63_v22  ;;  %v78_v32 = vmul.f32 %v67_v23, %v62_v19  ;;  %v84_v34 = vmul.f32 %v66_v20, %v64_v24  ;;  %v69_v44 = vld [vmem:[#allocation5 + $0xc] sm:$0xf]  ;;  %s188_s30 = sshll.u32 %s360_s3, 4  ;;  %s189_s30 = int_to_ptr.hbm [resolvable:$true] %s188_s30 }
  0x13   :  { %v85_v35 = vmul.f32 %v67_v23, %v65_v25  ;;  %v91_v36 = vmul.f32 %v66_v20, %v65_v25  ;;  %v92_v37 = vmul.f32 %v67_v23, %v64_v24  ;;  %v73_v39 = vmul.f32 %v68_v28, %v64_v24 }
  0x14   :  { %v104_v4 = vrot.slane %v103_v3, 2  ;;  %v72_v40 = vsub.f32 %v70_v27, %v71_v29  ;;  %v79_v42 = vadd.f32 %v78_v32, %v77_v31  ;;  %v80_v43 = vmul.f32 %v68_v28, %v65_v25 }
  0x15   :  { %v86_v45 = vsub.f32 %v84_v34, %v85_v35  ;;  %v87_v46 = vmul.f32 %v68_v28, %v62_v19  ;;  %v93_v47 = vadd.f32 %v92_v37, %v91_v36  ;;  %v94_v48 = vmul.f32 %v68_v28, %v63_v22 }
  0x16   :  { %v105_v5 = vmax.f32 %v103_v3, %v104_v4  ;;  %v74_v49 = vsub.f32 %v72_v40, %v73_v39  ;;  %v75_v50 = vmul.f32 %v69_v44, %v65_v25  ;;  %v81_v51 = vadd.f32 %v80_v43, %v79_v42 }
  0x17   :  { %v82_v52 = vmul.f32 %v69_v44, %v64_v24  ;;  %v88_v53 = vadd.f32 %v87_v46, %v86_v45  ;;  %v89_v54 = vmul.f32 %v69_v44, %v63_v22  ;;  %v95_v55 = vsub.f32 %v93_v47, %v94_v48 }
  0x18   :  { %v106_v6 = vrot.slane %v105_v5, 1  ;;  %v96_v56 = vmul.f32 %v69_v44, %v62_v19  ;;  %v76_v58 = vsub.f32 %v74_v49, %v75_v50 }
  0x19   :  { %v83_v60 = vsub.f32 %v81_v51, %v82_v52  ;;  %v90_v61 = vadd.f32 %v89_v54, %v88_v53 }
  0x1a   :  { %v107_v8 = vmax.f32 %v105_v5, %v106_v6  ;;  %v97_v62 = vadd.f32 %v96_v56, %v95_v55 }
  0x1c   :  { %v108_v9 = vmax.f32 %v107_v8, %v98_v7  ;;  %v128_v8 = vld [vmem:[#allocation7] sm:$0xf] }
  0x1d   :  { %v155_v19 = vrot.slane %v128_v8, 2  ;;  %v168_v24 = vrot.slane %v128_v8, 3 }
  0x1e   :  { %v112_v10 = vperm.slane %v108_v9, 0  ;;  %v109_v13 = vsub.f32 %v98_v7, %v108_v9 }
  0x20   :  { %v113_v11 = vsub.f32 %v99_v0, %v112_v10  ;;  %v110_v15 = vmul.f32 1.442695, %v109_v13 }
  0x22   :  { %v114_v12 = vmul.f32 1.442695, %v113_v11 }
  0x24   :  { %205 = vpow2.f32 %v114_v12 }
  0x25   :  { %207 = vpow2.f32 %v110_v15 }
  0x2a   :  { %v206_v14 = vpop.eup %205 }
  0x2b   :  { %v116_v16 = vsel %vm100_vm0, %v206_v14, 0.0  ;;  %v208_v33 = vpop.eup %207 }
  0x2c   :  { %v117_v17 = vrot.slane %v116_v16, 4 }
  0x2e   :  { %v118_v18 = vadd.f32 %v117_v17, %v116_v16 }
  0x30   :  { %v119_v21 = vrot.slane %v118_v18, 2 }
  0x32   :  { %v120_v26 = vadd.f32 %v119_v21, %v118_v18  ;;  %v142_v18 = vrot.slane %v128_v8, 1 }
  0x34   :  { %v121_v30 = vrot.slane %v120_v26, 1 }
  0x36   :  { %v122_v38 = vadd.f32 %v121_v30, %v120_v26 }
  0x38   :  { %v123_v41 = vadd.f32 %v208_v33, %v122_v38 }
  0x3a   :  { %209 = vrcp.f32 %v123_v41 }
  0x40   :  { %v210_v57 = vpop.eup %209 }
  0x41   :  { %v126_v59 = vperm.slane %v210_v57, 0  ;;  %v125_v17 = vmul.f32 %v210_v57, %v208_v33 }
  0x43   :  { %v127_v63 = vmul.f32 %v206_v14, %v126_v59  ;;  %v129_v29 = vmul.f32 %v128_v8, %v125_v17  ;;  %v144_v30 = vmul.f32 %v142_v18, %v125_v17  ;;  %v157_v31 = vmul.f32 %v155_v19, %v125_v17 }
  0x44   :  { %v170_v37 = vmul.f32 %v168_v24, %v125_v17 }
  0x45   :  { %v130_v0 = vmul.f32 %v127_v63, %v76_v58  ;;  %v145_v1 = vmul.f32 %v127_v63, %v83_v60  ;;  %v158_v2 = vmul.f32 %v127_v63, %v90_v61  ;;  %v171_v3 = vmul.f32 %v127_v63, %v97_v62 }
  0x47   :  { %v131_v4 = vsel %vm100_vm0, %v130_v0, 0.0  ;;  %v146_v5 = vsel %vm100_vm0, %v145_v1, 0.0  ;;  %v159_v6 = vsel %vm100_vm0, %v158_v2, 0.0  ;;  %v172_v7 = vsel %vm100_vm0, %v171_v3, 0.0 }
  0x48   :  { %v132_v9 = vrot.slane %v131_v4, 4  ;;  %v147_v10 = vrot.slane %v146_v5, 4  ;;  %v160_v11 = vrot.slane %v159_v6, 4  ;;  %v173_v12 = vrot.slane %v172_v7, 4 }
  0x4a   :  { %v133_v13 = vadd.f32 %v132_v9, %v131_v4  ;;  %v148_v15 = vadd.f32 %v147_v10, %v146_v5  ;;  %v161_v14 = vadd.f32 %v160_v11, %v159_v6  ;;  %v174_v16 = vadd.f32 %v173_v12, %v172_v7 }
  0x4c   :  { %v134_v20 = vrot.slane %v133_v13, 2  ;;  %v149_v21 = vrot.slane %v148_v15, 2  ;;  %v162_v22 = vrot.slane %v161_v14, 2  ;;  %v175_v23 = vrot.slane %v174_v16, 2 }
  0x4e   :  { %v135_v25 = vadd.f32 %v134_v20, %v133_v13  ;;  %v150_v26 = vadd.f32 %v149_v21, %v148_v15  ;;  %v163_v27 = vadd.f32 %v162_v22, %v161_v14  ;;  %v176_v28 = vadd.f32 %v175_v23, %v174_v16 }
  0x50   :  { %v136_v32 = vrot.slane %v135_v25, 1  ;;  %v151_v34 = vrot.slane %v150_v26, 1  ;;  %v164_v35 = vrot.slane %v163_v27, 1  ;;  %v177_v36 = vrot.slane %v176_v28, 1 }
  0x52   :  { %v137_v33 = vadd.f32 %v136_v32, %v135_v25  ;;  %v152_v38 = vadd.f32 %v151_v34, %v150_v26  ;;  %v165_v39 = vadd.f32 %v164_v35, %v163_v27  ;;  %v178_v40 = vadd.f32 %v177_v36, %v176_v28 }
  0x54   :  { %v138_v41 = vadd.f32 %v137_v33, %v129_v29  ;;  %v153_v42 = vadd.f32 %v152_v38, %v144_v30  ;;  %v166_v43 = vadd.f32 %v165_v39, %v157_v31  ;;  %v179_v44 = vadd.f32 %v178_v40, %v170_v37 }
  0x56   :  { %140 = vst.msk [vmem:[#allocation8] sm:$0x1] %vm139_vm1, %v138_v41 }
  0x57   :  { %154 = vst.msk [vmem:[#allocation8 + $0x1] sm:$0x1] %vm139_vm1, %v153_v42 }
  0x58   :  { %167 = vst.msk [vmem:[#allocation8 + $0x2] sm:$0x1] %vm139_vm1, %v166_v43 }
  0x59   :  { %180 = vst.msk [vmem:[#allocation8 + $0x3] sm:$0x1] %vm139_vm1, %v179_v44 }
  0x5a   :  { %191 = dma.vmem_to_hbm [thread:$0]  %s187_s2, 64, %s189_s30, [#allocation4]  }
  0x5b   :  { %311 = dma.done.wait [#allocation4], 64  }
  0x5c   :  { %312 = vsyncadd [#allocation4], 4294967232 }
  0x5d   :  { %196 = vsyncpa [#allocation3], 1 }
  0x5e   :  { %197 = vsyncpa [#allocation6], 1 }
  0x5f   :  { %198 = vsyncpa [#allocation4], 1 }

</bundles_post_ra>
